<compile_context>
chip_gen: v6e
topology: v6e:2x2x1
jax: 0.10.0
libtpu: 0.0.40
codegen_flags: <defaults>
</compile_context>

<pallas_src>
import functools

import jax
import jax.numpy as jnp
from jax.experimental import pallas as pl
from jax.experimental.pallas import tpu as pltpu

_LANE = 128
_SUBLANE = 8
_MAX_TILE_B = 1024            # per-tile VMEM footprint ~5 MiB -> fine on all gens
_MIN_PARALLEL_BATCH = 256     # split into >=2 tiles above this (v7x has 2 TCs)


def _round_up(x, m):
    return ((x + m - 1) // m) * m


def _choose_batch_tiling(B, max_tile_b=_MAX_TILE_B):
    """Balanced tiling: minimizes batch padding, keeps >=2 tiles for big B."""
    n_tiles = pl.cdiv(B, max_tile_b)
    if B >= _MIN_PARALLEL_BATCH:
        n_tiles = max(n_tiles, 2)           # keep both v7x TensorCores busy
    tile_b = _round_up(pl.cdiv(B, n_tiles), _SUBLANE)
    n_tiles = pl.cdiv(B, tile_b)
    b_p = n_tiles * tile_b
    return tile_b, n_tiles, b_p


def _actor_kernel(x_ref, w1_ref, b1_ref, w2_ref, b2_ref, w3_ref, b3_ref,
                  o_ref, *, max_action):
    # Layer 1: [tB, S] @ [S, H1p] (MXU, f32 acc) + bias -> relu (VPU, f32).
    # x is read un-padded from HBM and cast to the MXU dtype in-register.
    x = x_ref[...].astype(w1_ref.dtype)
    h1 = jnp.dot(x, w1_ref[...], preferred_element_type=jnp.float32)
    h1 = jnp.maximum(h1 + b1_ref[...], 0.0)
    # Layer 2: [tB, H1p] @ [H1p, H2p]
    h2 = jnp.dot(h1.astype(w2_ref.dtype), w2_ref[...],
                 preferred_element_type=jnp.float32)
    h2 = jnp.maximum(h2 + b2_ref[...], 0.0)
    # Layer 3: [tB, H2p] @ [H2p, A] -> max_action * tanh; narrow (real-width)
    # store: same vst count, ~32x less HBM writeback than a 128-lane pad.
    h3 = jnp.dot(h2.astype(w3_ref.dtype), w3_ref[...],
                 preferred_element_type=jnp.float32)
    o_ref[...] = (max_action * jnp.tanh(h3 + b3_ref[...])).astype(o_ref.dtype)


def prepare_actor_params(params, *, compute_dtype=jnp.bfloat16):
    """Pad hidden dims to lane multiples & cast once (hoisted out of forward).

    Weights are [in, out]; biases are [1, out]. Padded columns/rows are exactly
    zero, so padded hidden lanes stay zero through relu and the result is exact
    (up to compute_dtype rounding).
    """
    w1, b1, w2, b2, w3, b3 = params
    h1, h2 = w1.shape[1], w2.shape[1]
    h1_p = _round_up(h1, _LANE)   # 400 -> 512
    h2_p = _round_up(h2, _LANE)   # 300 -> 384

    w1_p = jnp.pad(w1, ((0, 0), (0, h1_p - h1))).astype(compute_dtype)
    b1_p = jnp.pad(b1, ((0, 0), (0, h1_p - h1))).astype(jnp.float32)
    w2_p = jnp.pad(w2, ((0, h1_p - h1), (0, h2_p - h2))).astype(compute_dtype)
    b2_p = jnp.pad(b2, ((0, 0), (0, h2_p - h2))).astype(jnp.float32)
    w3_p = jnp.pad(w3, ((0, h2_p - h2), (0, 0))).astype(compute_dtype)
    b3_p = b3.astype(jnp.float32)
    return (w1_p, b1_p, w2_p, b2_p, w3_p, b3_p)


def actor_forward(state, padded_params, max_action, *, max_tile_b=_MAX_TILE_B):
    """state: [B, state_dim] f32. padded_params from prepare_actor_params().

    Returns [B, action_dim] f32. max_action must be a static Python scalar.
    """
    w1_p, b1_p, w2_p, b2_p, w3_p, b3_p = padded_params
    B, state_dim = state.shape
    h1_p = w1_p.shape[1]
    h2_p = w2_p.shape[1]
    action_dim = w3_p.shape[1]

    tile_b, n_tiles, b_p = _choose_batch_tiling(B, max_tile_b)

    # Only the batch axis is ever padded (to a multiple of the tile); the
    # feature axis of x and the action axis of the output stay un-padded.
    x_p = state if b_p == B else jnp.pad(state, ((0, b_p - B), (0, 0)))

    kernel = functools.partial(_actor_kernel, max_action=float(max_action))

    flops = 2 * b_p * (state_dim * h1_p + h1_p * h2_p + h2_p * action_dim)
    bytes_accessed = int(
        x_p.size * x_p.dtype.itemsize
        + sum(a.size * a.dtype.itemsize
              for a in (w1_p, b1_p, w2_p, b2_p, w3_p, b3_p))
        + b_p * action_dim * 4)

    const2 = lambda i: (0, 0)   # weights/biases stay resident across the grid

    out_padded = pl.pallas_call(
        kernel,
        out_shape=jax.ShapeDtypeStruct((b_p, action_dim), jnp.float32),
        grid=(n_tiles,),
        in_specs=[
            pl.BlockSpec((tile_b, state_dim), lambda i: (i, 0)),  # state tile
            pl.BlockSpec((state_dim, h1_p), const2),              # w1
            pl.BlockSpec((1, h1_p), const2),                      # b1
            pl.BlockSpec((h1_p, h2_p), const2),                   # w2
            pl.BlockSpec((1, h2_p), const2),                      # b2
            pl.BlockSpec((h2_p, action_dim), const2),             # w3
            pl.BlockSpec((1, action_dim), const2),                # b3
        ],
        out_specs=pl.BlockSpec((tile_b, action_dim), lambda i: (i, 0)),
        compiler_params=pltpu.CompilerParams(
            dimension_semantics=("parallel",)),
        cost_estimate=pl.CostEstimate(
            flops=flops,
            transcendentals=b_p * action_dim,
            bytes_accessed=bytes_accessed),
    )(x_p, w1_p, b1_p, w2_p, b2_p, w3_p, b3_p)

    return out_padded if b_p == B else out_padded[:B]


def init_actor_params(key, state_dim, action_dim):
    """Deterministic small-scale init. Weights stored as [in, out]."""
    k1, k2, k3, k4, k5, k6 = jax.random.split(key, 6)
    scale = 0.05
    w1 = scale * jax.random.normal(k1, (state_dim, 400), jnp.float32)
    b1 = scale * jax.random.normal(k2, (1, 400), jnp.float32)
    w2 = scale * jax.random.normal(k3, (400, 300), jnp.float32)
    b2 = scale * jax.random.normal(k4, (1, 300), jnp.float32)
    w3 = scale * jax.random.normal(k5, (300, action_dim), jnp.float32)
    b3 = scale * jax.random.normal(k6, (1, action_dim), jnp.float32)
    return (w1, b1, w2, b2, w3, b3)


def actor_reference(state, params, max_action):
    w1, b1, w2, b2, w3, b3 = params
    h1 = jnp.maximum(state @ w1 + b1, 0.0)
    h2 = jnp.maximum(h1 @ w2 + b2, 0.0)
    return max_action * jnp.tanh(h2 @ w3 + b3)


if __name__ == "__main__":
    key = jax.random.PRNGKey(0)
    k_params, k_s0, k_s1, k_s2 = jax.random.split(key, 4)

    state_dim = 16
    action_dim = 4
    max_action = 2.0
    params = init_actor_params(k_params, state_dim, action_dim)

    # Pad/cast weights once (hoisted out of the per-call path).
    padded_bf16 = prepare_actor_params(params, compute_dtype=jnp.bfloat16)
    padded_f32 = prepare_actor_params(params, compute_dtype=jnp.float32)

    # Small (acting-size) batch: single-block path.
    state_small = jax.random.normal(k_s0, (8, state_dim), jnp.float32)
    out_small = jax.block_until_ready(
        actor_forward(state_small, padded_bf16, max_action))
    ref_small = actor_reference(state_small, params, max_action)
    assert out_small.shape == (8, action_dim)
    assert jnp.allclose(out_small, ref_small, atol=3e-2, rtol=3e-2), (
        float(jnp.max(jnp.abs(out_small - ref_small))))

    # Training-size batch: multi-tile gridded path (2 x 1024-row tiles).
    state_big = jax.random.normal(k_s1, (2048, state_dim), jnp.float32)
    out_big = jax.block_until_ready(
        actor_forward(state_big, padded_bf16, max_action))
    ref_big = actor_reference(state_big, params, max_action)
    assert out_big.shape == (2048, action_dim)
    assert jnp.allclose(out_big, ref_big, atol=3e-2, rtol=3e-2), (
        float(jnp.max(jnp.abs(out_big - ref_big))))

    # Ragged batch (exercises balanced tiling + batch padding path).
    state_rag = jax.random.normal(k_s2, (300, state_dim), jnp.float32)
    out_rag = jax.block_until_ready(
        actor_forward(state_rag, padded_bf16, max_action))
    ref_rag = actor_reference(state_rag, params, max_action)
    assert out_rag.shape == (300, action_dim)
    assert jnp.allclose(out_rag, ref_rag, atol=3e-2, rtol=3e-2), (
        float(jnp.max(jnp.abs(out_rag - ref_rag))))

    # Exact-path check with f32 operands (no bf16 rounding).
    out_f32 = jax.block_until_ready(
        actor_forward(state_small, padded_f32, max_action))
    assert jnp.allclose(out_f32, ref_small, atol=1e-4, rtol=1e-4)

    print("KERNEL_OK")
</pallas_src>

<mosaic_0001>
module attributes {stable_mosaic.version = 11 : i64} {
  func.func @_actor_kernel(%arg0: i32, %arg1: memref<8x16xf32, #tpu.memory_space<vmem>>, %arg2: memref<16x512xbf16, #tpu.memory_space<vmem>>, %arg3: memref<1x512xf32, #tpu.memory_space<vmem>>, %arg4: memref<512x384xbf16, #tpu.memory_space<vmem>>, %arg5: memref<1x384xf32, #tpu.memory_space<vmem>>, %arg6: memref<384x4xbf16, #tpu.memory_space<vmem>>, %arg7: memref<1x4xf32, #tpu.memory_space<vmem>>, %arg8: memref<8x4xf32, #tpu.memory_space<vmem>>) attributes {dimension_semantics = [#tpu.dimension_semantics<parallel>], iteration_bounds = array<i64: 1>, scalar_prefetch = 0 : i64, scratch_operands = 0 : i64, tpu.core_type = #tpu.core_type<tc>, window_params = [{transform_indices = @transform_0, window_bounds = array<i64: 8, 16>}, {pipeline_mode = #tpu.pipeline_mode<synchronous>, transform_indices = @transform_1, window_bounds = array<i64: 16, 512>}, {pipeline_mode = #tpu.pipeline_mode<synchronous>, transform_indices = @transform_2, window_bounds = array<i64: 1, 512>}, {pipeline_mode = #tpu.pipeline_mode<synchronous>, transform_indices = @transform_3, window_bounds = array<i64: 512, 384>}, {pipeline_mode = #tpu.pipeline_mode<synchronous>, transform_indices = @transform_4, window_bounds = array<i64: 1, 384>}, {pipeline_mode = #tpu.pipeline_mode<synchronous>, transform_indices = @transform_5, window_bounds = array<i64: 384, 4>}, {pipeline_mode = #tpu.pipeline_mode<synchronous>, transform_indices = @transform_6, window_bounds = array<i64: 1, 4>}, {transform_indices = @transform_7, window_bounds = array<i64: 8, 4>}]} {
    %c0 = arith.constant 0 : index
    %c0_0 = arith.constant 0 : index
    %0 = vector.load %arg1[%c0, %c0_0] : memref<8x16xf32, #tpu.memory_space<vmem>>, vector<8x16xf32>
    %1 = arith.truncf %0 : vector<8x16xf32> to vector<8x16xbf16>
    %c0_1 = arith.constant 0 : index
    %c0_2 = arith.constant 0 : index
    %2 = vector.load %arg2[%c0_1, %c0_2] : memref<16x512xbf16, #tpu.memory_space<vmem>>, vector<16x512xbf16>
    %cst = arith.constant dense<0.000000e+00> : vector<8x512xf32>
    %3 = tpu.matmul %1, %2, %cst {dimension_numbers = #tpu.dot_dimension_numbers<[1], [0], [0], [1], [0, 0, 1, 1], [], []>} : vector<8x16xbf16>, vector<16x512xbf16>, vector<8x512xf32> -> vector<8x512xf32>
    %c0_3 = arith.constant 0 : index
    %c0_4 = arith.constant 0 : index
    %4 = vector.load %arg3[%c0_3, %c0_4] : memref<1x512xf32, #tpu.memory_space<vmem>>, vector<1x512xf32>
    %5 = vector.broadcast %4 : vector<1x512xf32> to vector<8x512xf32>
    %6 = arith.addf %3, %5 : vector<8x512xf32>
    %cst_5 = arith.constant 0.000000e+00 : f32
    %7 = vector.broadcast %cst_5 : f32 to vector<8x512xf32>
    %8 = arith.maximumf %6, %7 : vector<8x512xf32>
    %9 = arith.truncf %8 : vector<8x512xf32> to vector<8x512xbf16>
    %c0_6 = arith.constant 0 : index
    %c0_7 = arith.constant 0 : index
    %10 = vector.load %arg4[%c0_6, %c0_7] : memref<512x384xbf16, #tpu.memory_space<vmem>>, vector<512x384xbf16>
    %cst_8 = arith.constant dense<0.000000e+00> : vector<8x384xf32>
    %11 = tpu.matmul %9, %10, %cst_8 {dimension_numbers = #tpu.dot_dimension_numbers<[1], [0], [0], [1], [0, 0, 1, 1], [], []>} : vector<8x512xbf16>, vector<512x384xbf16>, vector<8x384xf32> -> vector<8x384xf32>
    %c0_9 = arith.constant 0 : index
    %c0_10 = arith.constant 0 : index
    %12 = vector.load %arg5[%c0_9, %c0_10] : memref<1x384xf32, #tpu.memory_space<vmem>>, vector<1x384xf32>
    %13 = vector.broadcast %12 : vector<1x384xf32> to vector<8x384xf32>
    %14 = arith.addf %11, %13 : vector<8x384xf32>
    %cst_11 = arith.constant 0.000000e+00 : f32
    %15 = vector.broadcast %cst_11 : f32 to vector<8x384xf32>
    %16 = arith.maximumf %14, %15 : vector<8x384xf32>
    %17 = arith.truncf %16 : vector<8x384xf32> to vector<8x384xbf16>
    %c0_12 = arith.constant 0 : index
    %c0_13 = arith.constant 0 : index
    %18 = vector.load %arg6[%c0_12, %c0_13] : memref<384x4xbf16, #tpu.memory_space<vmem>>, vector<384x4xbf16>
    %cst_14 = arith.constant dense<0.000000e+00> : vector<8x4xf32>
    %19 = tpu.matmul %17, %18, %cst_14 {dimension_numbers = #tpu.dot_dimension_numbers<[1], [0], [0], [1], [0, 0, 1, 1], [], []>} : vector<8x384xbf16>, vector<384x4xbf16>, vector<8x4xf32> -> vector<8x4xf32>
    %c0_15 = arith.constant 0 : index
    %c0_16 = arith.constant 0 : index
    %20 = vector.load %arg7[%c0_15, %c0_16] : memref<1x4xf32, #tpu.memory_space<vmem>>, vector<1x4xf32>
    %21 = vector.broadcast %20 : vector<1x4xf32> to vector<8x4xf32>
    %22 = arith.addf %19, %21 : vector<8x4xf32>
    %23 = math.tanh %22 : vector<8x4xf32>
    %cst_17 = arith.constant 2.000000e+00 : f32
    %24 = vector.broadcast %cst_17 : f32 to vector<8x4xf32>
    %25 = arith.mulf %24, %23 : vector<8x4xf32>
    %c0_18 = arith.constant 0 : index
    %c0_19 = arith.constant 0 : index
    %26 = vector.load %arg8[%c0_18, %c0_19] : memref<8x4xf32, #tpu.memory_space<vmem>>, vector<8x4xf32>
    tpu.vector_store %arg8[%c0_18, %c0_19], %25 {strides = array<i32>} : memref<8x4xf32, #tpu.memory_space<vmem>>, vector<8x4xf32>,
    return
  }
  func.func @transform_0(%arg0: i32) -> (i32, i32) {
    %c0_i32 = arith.constant 0 : i32
    %c0_i32_0 = arith.constant 0 : i32
    return %arg0, %c0_i32 : i32, i32
  }
  func.func @transform_1(%arg0: i32) -> (i32, i32) {
    %c0_i32 = arith.constant 0 : i32
    %c0_i32_0 = arith.constant 0 : i32
    %c0_i32_1 = arith.constant 0 : i32
    return %c0_i32, %c0_i32_0 : i32, i32
  }
  func.func @transform_2(%arg0: i32) -> (i32, i32) {
    %c0_i32 = arith.constant 0 : i32
    %c0_i32_0 = arith.constant 0 : i32
    %c0_i32_1 = arith.constant 0 : i32
    return %c0_i32, %c0_i32_0 : i32, i32
  }
  func.func @transform_3(%arg0: i32) -> (i32, i32) {
    %c0_i32 = arith.constant 0 : i32
    %c0_i32_0 = arith.constant 0 : i32
    %c0_i32_1 = arith.constant 0 : i32
    return %c0_i32, %c0_i32_0 : i32, i32
  }
  func.func @transform_4(%arg0: i32) -> (i32, i32) {
    %c0_i32 = arith.constant 0 : i32
    %c0_i32_0 = arith.constant 0 : i32
    %c0_i32_1 = arith.constant 0 : i32
    return %c0_i32, %c0_i32_0 : i32, i32
  }
  func.func @transform_5(%arg0: i32) -> (i32, i32) {
    %c0_i32 = arith.constant 0 : i32
    %c0_i32_0 = arith.constant 0 : i32
    %c0_i32_1 = arith.constant 0 : i32
    return %c0_i32, %c0_i32_0 : i32, i32
  }
  func.func @transform_6(%arg0: i32) -> (i32, i32) {
    %c0_i32 = arith.constant 0 : i32
    %c0_i32_0 = arith.constant 0 : i32
    %c0_i32_1 = arith.constant 0 : i32
    return %c0_i32, %c0_i32_0 : i32, i32
  }
  func.func @transform_7(%arg0: i32) -> (i32, i32) {
    %c0_i32 = arith.constant 0 : i32
    %c0_i32_0 = arith.constant 0 : i32
    return %arg0, %c0_i32 : i32, i32
  }
}

</mosaic_0001>

<bundles_post_ra>
// kernel: tpu_custom_call.1
= control target key start
LH: loop header
LB: loop body
LE: loop exit
PB: predicated region body
PF: predicated region fallthrough
CT: control target
= control target key end

     0   :  { %12 = vsyncpa [#allocation3], 0  ;;  %s1706_s24 = smov [#allocation2]   ;;  %s1880_s0 = inlined_call_operand.vmem [shape: f32[8,16], index: 0, kind: input, shape index: {}]   ;;  %s1881_s1 = inlined_call_operand.vmem [shape: bf16[16,512], index: 1, kind: input, shape index: {}]   ;;  %s1882_s2 = inlined_call_operand.vmem [shape: f32[1,512], index: 2, kind: input, shape index: {}]   ;;  %s1883_s3 = inlined_call_operand.hbm [shape: bf16[512,384], index: 3, kind: input, shape index: {}]   ;;  %s1884_s4 = inlined_call_operand.vmem [shape: f32[1,384], index: 4, kind: input, shape index: {}]   ;;  %s1885_s5 = inlined_call_operand.vmem [shape: bf16[384,4], index: 5, kind: input, shape index: {}]   ;;  %s1886_s6 = inlined_call_operand.vmem [shape: f32[1,4], index: 6, kind: input, shape index: {}]   ;;  %s1887_s7 = inlined_call_operand.vmem [shape: f32[8,4], index: 7, kind: output, shape index: {}]  }
   0x1   :  { %s24_s25 = sshll.u32 %s1706_s24, 4  ;;  %s25_s25 = int_to_ptr.vmem [resolvable:$true] %s24_s25 }
   0x2   :  { %s1692_s26 = scalar_lea.vmem %s25_s25, 12288  ;;  %p1697_p1 = scmp.lt.s32.totalorder %s25_s25, %s25_s25 }
   0x3   :  { %p1693_p0 = scmp.ne.s32.totalorder %s25_s25, %s1692_s26  ;;  %p1698_p2 = scmp.lt.s32.totalorder %s1692_s26, %s1692_s26 }
   0x5   :  { %p1699_p3 = por %p1698_p2, %p1697_p1 }
   0x7   :  { %p1700_p4 = pnand %p1699_p3, %p1693_p0 }
   0x9   :  { %1703 = shalt.err (!%p1700_p4)
}
   0xa   :  { %s1707_s27 = smov 192   ;;  %s1708_s28 = smov 12  }
   0xb   :  { %30 = dma.hbm_to_vmem [thread:$0]  %s1883_s3, 12288, %s25_s25, [#allocation3], %s1707_s27, %s1707_s27, %s1708_s28  }
   0xc   :  { %1704 = dma.done.wait [#allocation3], 12288  }
   0xd   :  { %1705 = vsyncadd [#allocation3], 4294955008  ;;  %v1709_v0 = vmov 0   ;;  %v1524_v1 = vld [vmem:[%s1881_s1 + $0x4] ss:$16 sps:$4 sm:$0xff]   ;;  %vm89_vm0 = vcmask 130048  }
   0xe   :  { %125 = vmatprep.mubr.bf16.mxu0 %v1709_v0  ;;  %166 = vmatprep.mubr.bf16.mxu1 %v1709_v0  ;;  %v1526_v2 = vld [vmem:[%s1881_s1 + $0xc] ss:$16 sps:$4 sm:$0xff]   ;;  %v1528_v3 = vld [vmem:[%s1881_s1] ss:$16 sps:$4 sm:$0xff]   ;;  %v1529_v4 = vld [vmem:[%s1881_s1 + $0x8] ss:$16 sps:$4 sm:$0xff]  }
   0xf   :  { %107 = vmatprep.subr.bf16.mxu0 %v1524_v1  ;;  %v41_v5 = vld [vmem:[%s1880_s0] sm:$0xff]  ;;  %148 = vmatprep.subr.bf16.mxu1 %v1526_v2  ;;  %v1530_v7 = vld [vmem:[#allocation2 + $0xa8] ss:$12 sps:$4 sm:$0xff]   ;;  %v1532_v8 = vld [vmem:[#allocation2 + $0xac] ss:$12 sps:$4 sm:$0xff]   ;;  %vm1711_vm1 = vmmov 0  }
  0x10   :  { %v42_v6 = vpack.c.bf16 %v41_v5, %v41_v5  ;;  %108 = vmatpush1.bf16.msra.mxu0 %v1528_v3  ;;  %149 = vmatpush1.bf16.msra.mxu1 %v1529_v4  ;;  %v1533_v9 = vld [vmem:[#allocation2 + $0x228] ss:$12 sps:$4 sm:$0xff]   ;;  %v1535_v10 = vld [vmem:[#allocation2 + $0x22c] ss:$12 sps:$4 sm:$0xff]   ;;  %v1536_v12 = vld [vmem:[#allocation2 + $0x90] ss:$12 sps:$4 sm:$0xff]  }
  0x11   :  { %840 = vmatprep.subr.bf16.mxu0 %v1532_v8  ;;  %v1538_v11 = vld [vmem:[#allocation2 + $0x94] ss:$12 sps:$4 sm:$0xff]   ;;  %881 = vmatprep.subr.bf16.mxu1 %v1535_v10  ;;  %v1539_v14 = vld [vmem:[#allocation2 + $0x210] ss:$12 sps:$4 sm:$0xff]   ;;  %v1542_v17 = vld [vmem:[#allocation2 + $0x78] ss:$12 sps:$4 sm:$0xff]  }
  0x12   :  { %v1541_v13 = vld [vmem:[#allocation2 + $0x214] ss:$12 sps:$4 sm:$0xff]   ;;  %v1544_v15 = vld [vmem:[#allocation2 + $0x7c] ss:$12 sps:$4 sm:$0xff]   ;;  %v1545_v18 = vld [vmem:[#allocation2 + $0x1f8] ss:$12 sps:$4 sm:$0xff]  }
  0x13   :  { %1300 = vmatmul.mubr.msk.bf16.vlgmr.msra.gmra.mxu0 %vm89_vm0, %v42_v6  ;;  %1301 = vmatmul.mubr.msk.bf16.vlgmr.msra.gmra.mxu1 %vm89_vm0, %v42_v6  ;;  %v1547_v16 = vld [vmem:[#allocation2 + $0x1fc] ss:$12 sps:$4 sm:$0xff]   ;;  %v1550_v19 = vld [vmem:[#allocation2 + $0x64] ss:$12 sps:$4 sm:$0xff]   ;;  %v1548_v21 = vld [vmem:[#allocation2 + $0x60] ss:$12 sps:$4 sm:$0xff]  }
  0x14   :  { %841 = vmatpush1.bf16.msra.mxu0 %v1530_v7  ;;  %882 = vmatpush1.bf16.msra.mxu1 %v1533_v9  ;;  %v1553_v20 = vld [vmem:[#allocation2 + $0x1e4] ss:$12 sps:$4 sm:$0xff]   ;;  %v1551_v22 = vld [vmem:[#allocation2 + $0x1e0] ss:$12 sps:$4 sm:$0xff]   ;;  %v1554_v25 = vld [vmem:[#allocation2 + $0x48] ss:$12 sps:$4 sm:$0xff]   ;;  %v49_v9 = vlaneseq }
  0x15   :  { %842 = vmatprep.subr.bf16.mxu0 %v1538_v11  ;;  %883 = vmatprep.subr.bf16.mxu1 %v1541_v13  ;;  %v1556_v23 = vld [vmem:[#allocation2 + $0x4c] ss:$12 sps:$4 sm:$0xff]   ;;  %v1557_v26 = vld [vmem:[#allocation2 + $0x1c8] ss:$12 sps:$4 sm:$0xff]   ;;  %v1560_v29 = vld [vmem:[#allocation2 + $0x30] ss:$12 sps:$4 sm:$0xff]  }
  0x16   :  { %v1559_v24 = vld [vmem:[#allocation2 + $0x1cc] ss:$12 sps:$4 sm:$0xff]   ;;  %v1562_v27 = vld [vmem:[#allocation2 + $0x34] ss:$12 sps:$4 sm:$0xff]   ;;  %v1563_v30 = vld [vmem:[#allocation2 + $0x1b0] ss:$12 sps:$4 sm:$0xff]  }
  0x17   :  { %v1565_v28 = vld [vmem:[#allocation2 + $0x1b4] ss:$12 sps:$4 sm:$0xff]   ;;  %v1568_v31 = vld [vmem:[#allocation2 + $0x1c] ss:$12 sps:$4 sm:$0xff]   ;;  %v1566_v33 = vld [vmem:[#allocation2 + $0x18] ss:$12 sps:$4 sm:$0xff]  }
  0x18   :  { %843 = vmatpush1.bf16.msra.mxu0 %v1536_v12  ;;  %884 = vmatpush1.bf16.msra.mxu1 %v1539_v14  ;;  %v1571_v32 = vld [vmem:[#allocation2 + $0x19c] ss:$12 sps:$4 sm:$0xff]   ;;  %v1569_v34 = vld [vmem:[#allocation2 + $0x198] ss:$12 sps:$4 sm:$0xff]   ;;  %v1572_v37 = vld [vmem:[#allocation2] ss:$12 sps:$4 sm:$0xff]  }
  0x19   :  { %844 = vmatprep.subr.bf16.mxu0 %v1544_v15  ;;  %885 = vmatprep.subr.bf16.mxu1 %v1547_v16  ;;  %v1574_v35 = vld [vmem:[#allocation2 + $0x4] ss:$12 sps:$4 sm:$0xff]   ;;  %v1575_v38 = vld [vmem:[#allocation2 + $0x180] ss:$12 sps:$4 sm:$0xff]   ;;  %v1578_v41 = vld [vmem:[#allocation2 + $0x168] ss:$12 sps:$4 sm:$0xff]  }
  0x1a   :  { %v1577_v36 = vld [vmem:[#allocation2 + $0x184] ss:$12 sps:$4 sm:$0xff]   ;;  %v1580_v39 = vld [vmem:[#allocation2 + $0x16c] ss:$12 sps:$4 sm:$0xff]   ;;  %v1581_v42 = vld [vmem:[#allocation2 + $0x2e8] ss:$12 sps:$4 sm:$0xff]  }
  0x1b   :  { %v1583_v40 = vld [vmem:[#allocation2 + $0x2ec] ss:$12 sps:$4 sm:$0xff]   ;;  %v1586_v43 = vld [vmem:[#allocation2 + $0x154] ss:$12 sps:$4 sm:$0xff]   ;;  %v1584_v44 = vld [vmem:[#allocation2 + $0x150] ss:$12 sps:$4 sm:$0xff]  }
  0x1c   :  { %845 = vmatpush1.bf16.msra.mxu0 %v1542_v17  ;;  %886 = vmatpush1.bf16.msra.mxu1 %v1545_v18  ;;  %v1589_v45 = vld [vmem:[#allocation2 + $0x2d4] ss:$12 sps:$4 sm:$0xff]   ;;  %v1587_v46 = vld [vmem:[#allocation2 + $0x2d0] ss:$12 sps:$4 sm:$0xff]   ;;  %v1590_v49 = vld [vmem:[#allocation2 + $0x138] ss:$12 sps:$4 sm:$0xff]  }
  0x1d   :  { %846 = vmatprep.subr.bf16.mxu0 %v1550_v19  ;;  %887 = vmatprep.subr.bf16.mxu1 %v1553_v20  ;;  %v1592_v47 = vld [vmem:[#allocation2 + $0x13c] ss:$12 sps:$4 sm:$0xff]   ;;  %v1593_v50 = vld [vmem:[#allocation2 + $0x2b8] ss:$12 sps:$4 sm:$0xff]   ;;  %v1596_v53 = vld [vmem:[#allocation2 + $0x120] ss:$12 sps:$4 sm:$0xff]  }
  0x1e   :  { %v1595_v48 = vld [vmem:[#allocation2 + $0x2bc] ss:$12 sps:$4 sm:$0xff]   ;;  %v1598_v51 = vld [vmem:[#allocation2 + $0x124] ss:$12 sps:$4 sm:$0xff]   ;;  %v1599_v54 = vld [vmem:[#allocation2 + $0x2a0] ss:$12 sps:$4 sm:$0xff]  }
  0x1f   :  { %v1601_v52 = vld [vmem:[#allocation2 + $0x2a4] ss:$12 sps:$4 sm:$0xff]   ;;  %v1604_v55 = vld [vmem:[#allocation2 + $0x10c] ss:$12 sps:$4 sm:$0xff]   ;;  %v1602_v57 = vld [vmem:[#allocation2 + $0x108] ss:$12 sps:$4 sm:$0xff]  }
  0x20   :  { %847 = vmatpush1.bf16.msra.mxu0 %v1548_v21  ;;  %888 = vmatpush1.bf16.msra.mxu1 %v1551_v22  ;;  %v1607_v56 = vld [vmem:[#allocation2 + $0x28c] ss:$12 sps:$4 sm:$0xff]   ;;  %v1605_v58 = vld [vmem:[#allocation2 + $0x288] ss:$12 sps:$4 sm:$0xff]   ;;  %v1608_v61 = vld [vmem:[#allocation2 + $0xf0] ss:$12 sps:$4 sm:$0xff]  }
  0x21   :  { %848 = vmatprep.subr.bf16.mxu0 %v1556_v23  ;;  %889 = vmatprep.subr.bf16.mxu1 %v1559_v24  ;;  %v1610_v59 = vld [vmem:[#allocation2 + $0xf4] ss:$12 sps:$4 sm:$0xff]   ;;  %v1611_v62 = vld [vmem:[#allocation2 + $0x270] ss:$12 sps:$4 sm:$0xff]   ;;  %v1614_v1 = vld [vmem:[#allocation2 + $0xd8] ss:$12 sps:$4 sm:$0xff]  }
  0x22   :  { %v1613_v60 = vld [vmem:[#allocation2 + $0x274] ss:$12 sps:$4 sm:$0xff]   ;;  %v1616_v63 = vld [vmem:[#allocation2 + $0xdc] ss:$12 sps:$4 sm:$0xff]   ;;  %v1617_v2 = vld [vmem:[#allocation2 + $0x258] ss:$12 sps:$4 sm:$0xff]  }
  0x23   :  { %v1619_v0 = vld [vmem:[#allocation2 + $0x25c] ss:$12 sps:$4 sm:$0xff]   ;;  %v1622_v3 = vld [vmem:[#allocation2 + $0xc4] ss:$12 sps:$4 sm:$0xff]   ;;  %v1620_v5 = vld [vmem:[#allocation2 + $0xc0] ss:$12 sps:$4 sm:$0xff]  }
  0x24   :  { %849 = vmatpush1.bf16.msra.mxu0 %v1554_v25  ;;  %890 = vmatpush1.bf16.msra.mxu1 %v1557_v26  ;;  %v1625_v4 = vld [vmem:[#allocation2 + $0x244] ss:$12 sps:$4 sm:$0xff]   ;;  %v1623_v6 = vld [vmem:[#allocation2 + $0x240] ss:$12 sps:$4 sm:$0xff]   ;;  %v1770_v10 = vshrl.u32 %v49_v9, 7  ;;  %vm1289_vm2 = vcmask 31744  }
  0x25   :  { %850 = vmatprep.subr.bf16.mxu0 %v1562_v27  ;;  %891 = vmatprep.subr.bf16.mxu1 %v1565_v28  ;;  %v1626_v7 = vld [vmem:[#allocation2 + $0x170] ss:$12 sps:$4 sm:$0xff]   ;;  %v47_v13 = vld [vmem:[%s1882_s2] sm:$0xf] }
  0x26   :  { %v1627_v8 = vld [vmem:[#allocation2 + $0x2f0] ss:$12 sps:$4 sm:$0xff]   ;;  %v51_v11 = vsub.s32 0, %v1770_v10  ;;  %v59_v12 = vsub.s32 2, %v1770_v10  ;;  %v55_v14 = vsub.s32 1, %v1770_v10  ;;  %v63_v15 = vsub.s32 3, %v1770_v10 }
  0x27   :  { %v1661_v9 = vld [vmem:[%s1885_s5 + $0x30] sm:$0xff]   ;;  %v1398_v10 = vld [vmem:[%s1886_s6] ss:$0 sm:$0xff] }
  0x28   :  { %851 = vmatpush1.bf16.msra.mxu0 %v1560_v29  ;;  %892 = vmatpush1.bf16.msra.mxu1 %v1563_v30  ;;  %v52_v16 = vrot.slane %v47_v13, %v51_v11  ;;  %v60_v17 = vrot.slane %v47_v13, %v59_v12  ;;  %v56_v18 = vrot.slane %v47_v13, %v55_v14 }
  0x29   :  { %852 = vmatprep.subr.bf16.mxu0 %v1568_v31  ;;  %893 = vmatprep.subr.bf16.mxu1 %v1571_v32  ;;  %v64_v19 = vrot.slane %v47_v13, %v63_v15  ;;  %v1662_v13 = vld [vmem:[%s1885_s5 + $0x68] sm:$0xff]  }
  0x2a   :  { %v1663_v15 = vld [vmem:[%s1885_s5 + $0x28] sm:$0xff]  }
  0x2c   :  { %853 = vmatpush1.bf16.msra.mxu0 %v1566_v33  ;;  %894 = vmatpush1.bf16.msra.mxu1 %v1569_v34 }
  0x2d   :  { %854 = vmatprep.subr.bf16.mxu0 %v1574_v35  ;;  %895 = vmatprep.subr.bf16.mxu1 %v1577_v36 }
  0x30   :  { %855 = vmatpush1.bf16.msra.mxu0 %v1572_v37  ;;  %896 = vmatpush1.bf16.msra.mxu1 %v1575_v38 }
  0x31   :  { %856 = vmatprep.subr.bf16.mxu0 %v1580_v39  ;;  %897 = vmatprep.subr.bf16.mxu1 %v1583_v40  ;;  %v1628_v39 = vld [vmem:[#allocation2 + $0xb0] ss:$12 sps:$4 sm:$0xff]  }
  0x32   :  { %v1629_v40 = vld [vmem:[#allocation2 + $0x230] ss:$12 sps:$4 sm:$0xff]  }
  0x34   :  { %857 = vmatpush2.bf16.msra.mxu0 %v1578_v41  ;;  %898 = vmatpush2.bf16.msra.mxu1 %v1581_v42  ;;  %v1630_v42 = vld [vmem:[#allocation2 + $0x158] ss:$12 sps:$4 sm:$0xff]  }
  0x35   :  { %858 = vmatprep.subr.bf16.mxu0 %v1586_v43  ;;  %899 = vmatprep.subr.bf16.mxu1 %v1589_v45  ;;  %v1631_v43 = vld [vmem:[#allocation2 + $0x2d8] ss:$12 sps:$4 sm:$0xff]  }
  0x36   :  { %v1633_v45 = vld [vmem:[#allocation2 + $0x218] ss:$12 sps:$4 sm:$0xff]  }
  0x38   :  { %859 = vmatpush2.bf16.msra.mxu0 %v1584_v44  ;;  %900 = vmatpush2.bf16.msra.mxu1 %v1587_v46  ;;  %v1632_v44 = vld [vmem:[#allocation2 + $0x98] ss:$12 sps:$4 sm:$0xff]   ;;  %v1634_v46 = vld [vmem:[#allocation2 + $0x140] ss:$12 sps:$4 sm:$0xff]  }
  0x39   :  { %860 = vmatprep.subr.bf16.mxu0 %v1592_v47  ;;  %901 = vmatprep.subr.bf16.mxu1 %v1595_v48  ;;  %v1635_v47 = vld [vmem:[#allocation2 + $0x2c0] ss:$12 sps:$4 sm:$0xff]  }
  0x3a   :  { %v1636_v48 = vld [vmem:[#allocation2 + $0x80] ss:$12 sps:$4 sm:$0xff]  }
  0x3c   :  { %861 = vmatpush2.bf16.msra.mxu0 %v1590_v49  ;;  %902 = vmatpush2.bf16.msra.mxu1 %v1593_v50  ;;  %v1637_v49 = vld [vmem:[#allocation2 + $0x200] ss:$12 sps:$4 sm:$0xff]   ;;  %v1638_v50 = vld [vmem:[#allocation2 + $0x128] ss:$12 sps:$4 sm:$0xff]  }
  0x3d   :  { %862 = vmatprep.subr.bf16.mxu0 %v1598_v51  ;;  %903 = vmatprep.subr.bf16.mxu1 %v1601_v52  ;;  %v1639_v51 = vld [vmem:[#allocation2 + $0x2a8] ss:$12 sps:$4 sm:$0xff]  }
  0x3e   :  { %v1640_v52 = vld [vmem:[#allocation2 + $0x68] ss:$12 sps:$4 sm:$0xff]  }
  0x40   :  { %863 = vmatpush2.bf16.msra.mxu0 %v1596_v53  ;;  %904 = vmatpush2.bf16.msra.mxu1 %v1599_v54  ;;  %v1641_v53 = vld [vmem:[#allocation2 + $0x1e8] ss:$12 sps:$4 sm:$0xff]   ;;  %v1642_v54 = vld [vmem:[#allocation2 + $0x110] ss:$12 sps:$4 sm:$0xff]  }
  0x41   :  { %864 = vmatprep.subr.bf16.mxu0 %v1604_v55  ;;  %905 = vmatprep.subr.bf16.mxu1 %v1607_v56  ;;  %v1643_v55 = vld [vmem:[#allocation2 + $0x290] ss:$12 sps:$4 sm:$0xff]  }
  0x42   :  { %v1644_v56 = vld [vmem:[#allocation2 + $0x50] ss:$12 sps:$4 sm:$0xff]  }
  0x44   :  { %865 = vmatpush2.bf16.msra.mxu0 %v1602_v57  ;;  %906 = vmatpush2.bf16.msra.mxu1 %v1605_v58  ;;  %v1645_v57 = vld [vmem:[#allocation2 + $0x1d0] ss:$12 sps:$4 sm:$0xff]   ;;  %v1646_v58 = vld [vmem:[#allocation2 + $0xf8] ss:$12 sps:$4 sm:$0xff]  }
  0x45   :  { %866 = vmatprep.subr.bf16.mxu0 %v1610_v59  ;;  %907 = vmatprep.subr.bf16.mxu1 %v1613_v60  ;;  %v1647_v59 = vld [vmem:[#allocation2 + $0x278] ss:$12 sps:$4 sm:$0xff]  }
  0x46   :  { %v1648_v60 = vld [vmem:[#allocation2 + $0x38] ss:$12 sps:$4 sm:$0xff]  }
  0x48   :  { %867 = vmatpush2.bf16.msra.mxu0 %v1608_v61  ;;  %908 = vmatpush2.bf16.msra.mxu1 %v1611_v62  ;;  %v1649_v61 = vld [vmem:[#allocation2 + $0x1b8] ss:$12 sps:$4 sm:$0xff]   ;;  %v1650_v62 = vld [vmem:[#allocation2 + $0xe0] ss:$12 sps:$4 sm:$0xff]  }
  0x49   :  { %868 = vmatprep.subr.bf16.mxu0 %v1616_v63  ;;  %909 = vmatprep.subr.bf16.mxu1 %v1619_v0  ;;  %v1651_v63 = vld [vmem:[#allocation2 + $0x260] ss:$12 sps:$4 sm:$0xff]  }
  0x4a   :  { %v1652_v0 = vld [vmem:[#allocation2 + $0x20] ss:$12 sps:$4 sm:$0xff]  }
  0x4c   :  { %869 = vmatpush2.bf16.msra.mxu0 %v1614_v1  ;;  %910 = vmatpush2.bf16.msra.mxu1 %v1617_v2  ;;  %v1653_v1 = vld [vmem:[#allocation2 + $0x1a0] ss:$12 sps:$4 sm:$0xff]   ;;  %v1654_v2 = vld [vmem:[#allocation2 + $0xc8] ss:$12 sps:$4 sm:$0xff]  }
  0x4d   :  { %870 = vmatprep.subr.bf16.mxu0 %v1622_v3  ;;  %911 = vmatprep.subr.bf16.mxu1 %v1625_v4  ;;  %v1655_v3 = vld [vmem:[#allocation2 + $0x248] ss:$12 sps:$4 sm:$0xff]  }
  0x4e   :  { %v1656_v4 = vld [vmem:[#allocation2 + $0x8] ss:$12 sps:$4 sm:$0xff]  }
  0x50   :  { %871 = vmatpush2.bf16.msra.mxu0 %v1620_v5  ;;  %912 = vmatpush2.bf16.msra.mxu1 %v1623_v6  ;;  %v1657_v5 = vld [vmem:[#allocation2 + $0x188] ss:$12 sps:$4 sm:$0xff]   ;;  %v1658_v6 = vld [vmem:[%s1885_s5 + $0x78] sm:$0xff]  }
  0x51   :  { %1423 = vmatprep.subr.bf16.mxu0 %v1626_v7  ;;  %1445 = vmatprep.subr.bf16.mxu1 %v1627_v8  ;;  %v1659_v7 = vld [vmem:[%s1885_s5 + $0x38] sm:$0xff]   ;;  %v1660_v8 = vld [vmem:[%s1885_s5 + $0x70] sm:$0xff]  }
  0xd3   :  { %v127_v20 = vpop.f32.mrf.mxu0  ;;  %v168_v21 = vpop.f32.mrf.mxu1 }
  0xd4   :  { %v128_v22 = vadd.f32 %v127_v20, %v52_v16  ;;  %v169_v23 = vadd.f32 %v168_v21, %v60_v17  ;;  %v1664_v16 = vld [vmem:[%s1885_s5 + $0x60] sm:$0xff]   ;;  %v1668_v20 = vld [vmem:[%s1885_s5 + $0x50] sm:$0xff]  }
  0xd5   :  { %v129_v24 = vpop.f32.mrf.mxu0  ;;  %v170_v25 = vpop.f32.mrf.mxu1  ;;  %v1665_v17 = vld [vmem:[%s1885_s5 + $0x20] sm:$0xff]   ;;  %v1669_v21 = vld [vmem:[%s1885_s5 + $0x10] sm:$0xff]  }
  0xd6   :  { %v177_v26 = vmax.f32 %v169_v23, 0.0  ;;  %v130_v27 = vadd.f32 %v129_v24, %v56_v18  ;;  %v171_v28 = vadd.f32 %v170_v25, %v64_v19  ;;  %v175_v29 = vmax.f32 %v128_v22, 0.0  ;;  %v1666_v18 = vld [vmem:[%s1885_s5 + $0x58] sm:$0xff]   ;;  %v1670_v22 = vld [vmem:[%s1885_s5 + $0x48] sm:$0xff]   ;;  %v1672_v24 = vld [vmem:[%s1885_s5 + $0x40] sm:$0xff]  }
  0xd7   :  { %v131_v30 = vpop.f32.mrf.mxu0  ;;  %v172_v31 = vpop.f32.mrf.mxu1  ;;  %v1667_v19 = vld [vmem:[%s1885_s5 + $0x18] sm:$0xff]   ;;  %v1671_v23 = vld [vmem:[%s1885_s5 + $0x8] sm:$0xff]   ;;  %v1673_v25 = vld [vmem:[%s1885_s5] sm:$0xff]  }
  0xd8   :  { %v176_v32 = vmax.f32 %v130_v27, 0.0  ;;  %v178_v33 = vmax.f32 %v171_v28, 0.0  ;;  %v1785_v34 = vpack.c.bf16 %v177_v26, %v177_v26  ;;  %v1787_v41 = vpack.c.bf16 %v175_v29, %v175_v29  ;;  %v1674_v26 = vld [vmem:[%s1885_s5 + $0xb8] sm:$0xff]   ;;  %v1675_v28 = vld [vmem:[%s1885_s5 + $0xb0] sm:$0xff]   ;;  %v1676_v29 = vld [vmem:[%s1885_s5 + $0xa8] sm:$0xff]  }
  0xd9   :  { %v132_v35 = vpop.f32.mrf.mxu0  ;;  %v173_v36 = vpop.f32.mrf.mxu1  ;;  %v1710_v27 = vmov 0.0   ;;  %v1677_v30 = vld [vmem:[%s1885_s5 + $0xa0] sm:$0xff]   ;;  %v1678_v31 = vld [vmem:[%s1885_s5 + $0x98] sm:$0xff]  }
  0xda   :  { %v180_v37 = vpack.c.bf16 %v176_v32, %v176_v32  ;;  %v182_v38 = vpack.c.bf16 %v178_v33, %v178_v33  ;;  %v1679_v32 = vld [vmem:[%s1885_s5 + $0x90] sm:$0xff]   ;;  %v1680_v33 = vld [vmem:[%s1885_s5 + $0x88] sm:$0xff]   ;;  %v311_v35 = vld [vmem:[%s1884_s4] sm:$0x7] }
  0xdb   :  { %v316_v36 = vrot.slane %v311_v35, %v51_v11 }
  0xdc   :  { %872 = vmatprep.mubr.bf16.mxu0 %v180_v37  ;;  %913 = vmatprep.mubr.bf16.mxu1 %v182_v38 }
  0xdd   :  { %873 = vmatmul.mubr.bf16.vlgmr.msra.gmra.mxu0 %v1787_v41  ;;  %914 = vmatmul.mubr.bf16.vlgmr.msra.gmra.mxu1 %v1785_v34 }
  0xde   :  { %1424 = vmatpush3.bf16.msra.mxu0 %v1628_v39  ;;  %1446 = vmatpush3.bf16.msra.mxu1 %v1629_v40 }
  0xdf   :  { %954 = vmatprep.mubr.bf16.mxu0 %v180_v37  ;;  %994 = vmatprep.mubr.bf16.mxu1 %v182_v38  ;;  %v320_v37 = vrot.slane %v311_v35, %v55_v14 }
  0xe0   :  { %1425 = vmatprep.subr.bf16.mxu0 %v1630_v42  ;;  %1447 = vmatprep.subr.bf16.mxu1 %v1631_v43 }
  0xe2   :  { %1426 = vmatpush3.bf16.msra.mxu0 %v1632_v44  ;;  %1448 = vmatpush3.bf16.msra.mxu1 %v1633_v45 }
  0xe3   :  { %1427 = vmatprep.subr.bf16.mxu0 %v1634_v46  ;;  %1449 = vmatprep.subr.bf16.mxu1 %v1635_v47 }
  0xe6   :  { %1428 = vmatpush3.bf16.msra.mxu0 %v1636_v48  ;;  %1450 = vmatpush3.bf16.msra.mxu1 %v1637_v49 }
  0xe7   :  { %1429 = vmatprep.subr.bf16.mxu0 %v1638_v50  ;;  %1451 = vmatprep.subr.bf16.mxu1 %v1639_v51 }
  0xea   :  { %1430 = vmatpush3.bf16.msra.mxu0 %v1640_v52  ;;  %1452 = vmatpush3.bf16.msra.mxu1 %v1641_v53 }
  0xeb   :  { %1431 = vmatprep.subr.bf16.mxu0 %v1642_v54  ;;  %1453 = vmatprep.subr.bf16.mxu1 %v1643_v55  ;;  %v324_v54 = vrot.slane %v311_v35, %v59_v12 }
  0xee   :  { %1432 = vmatpush3.bf16.msra.mxu0 %v1644_v56  ;;  %1454 = vmatpush3.bf16.msra.mxu1 %v1645_v57 }
  0xef   :  { %1433 = vmatprep.subr.bf16.mxu0 %v1646_v58  ;;  %1455 = vmatprep.subr.bf16.mxu1 %v1647_v59 }
  0xf2   :  { %1434 = vmatpush3.bf16.msra.mxu0 %v1648_v60  ;;  %1456 = vmatpush3.bf16.msra.mxu1 %v1649_v61 }
  0xf3   :  { %1435 = vmatprep.subr.bf16.mxu0 %v1650_v62  ;;  %1457 = vmatprep.subr.bf16.mxu1 %v1651_v63 }
  0xf6   :  { %1436 = vmatpush3.bf16.msra.mxu0 %v1652_v0  ;;  %1458 = vmatpush3.bf16.msra.mxu1 %v1653_v1 }
  0xf7   :  { %1437 = vmatprep.subr.bf16.mxu0 %v1654_v2  ;;  %1459 = vmatprep.subr.bf16.mxu1 %v1655_v3 }
  0xfa   :  { %1438 = vmatpush3.bf16.msra.mxu0 %v1656_v4  ;;  %1460 = vmatpush3.bf16.msra.mxu1 %v1657_v5 }
  0xfb   :  { %1467 = vmatprep.subr.bf16.mxu0 %v1658_v6  ;;  %1498 = vmatprep.subr.bf16.mxu1 %v1710_v27 }
  0xfd   :  { %955 = vmatmul.mubr.bf16.vlgmr.msra.gmra.mxu0 %v1787_v41  ;;  %995 = vmatmul.mubr.bf16.vlgmr.msra.gmra.mxu1 %v1785_v34  ;;  %v1681_v34 = vld [vmem:[%s1885_s5 + $0x80] sm:$0xff]  }
  0xfe   :  { %1468 = vmatpush3.bf16.msra.mxu0 %v1659_v7  ;;  %1499 = vmatpush3.bf16.msra.mxu1 %v1674_v26 }
  0xff   :  { %1469 = vmatprep.subr.bf16.mxu0 %v1660_v8  ;;  %1500 = vmatprep.subr.bf16.mxu1 %v1710_v27 }
 0x100   :  { %1514 = vmatprep.mubr.msk.bf16.mxu1 %vm1711_vm1, %v1710_v27 }
 0x102   :  { %1470 = vmatpush3.bf16.msra.mxu0 %v1661_v9  ;;  %1501 = vmatpush3.bf16.msra.mxu1 %v1675_v28 }
 0x103   :  { %1471 = vmatprep.subr.bf16.mxu0 %v1662_v13  ;;  %1502 = vmatprep.subr.bf16.mxu1 %v1710_v27 }
 0x106   :  { %1472 = vmatpush3.bf16.msra.mxu0 %v1663_v15  ;;  %1503 = vmatpush3.bf16.msra.mxu1 %v1676_v29 }
 0x107   :  { %1473 = vmatprep.subr.bf16.mxu0 %v1664_v16  ;;  %1504 = vmatprep.subr.bf16.mxu1 %v1710_v27 }
 0x10a   :  { %1474 = vmatpush3.bf16.msra.mxu0 %v1665_v17  ;;  %1505 = vmatpush3.bf16.msra.mxu1 %v1677_v30 }
 0x10b   :  { %1475 = vmatprep.subr.bf16.mxu0 %v1666_v18  ;;  %1506 = vmatprep.subr.bf16.mxu1 %v1710_v27 }
 0x10e   :  { %1476 = vmatpush3.bf16.msra.mxu0 %v1667_v19  ;;  %1507 = vmatpush3.bf16.msra.mxu1 %v1678_v31 }
 0x10f   :  { %1477 = vmatprep.subr.bf16.mxu0 %v1668_v20  ;;  %1508 = vmatprep.subr.bf16.mxu1 %v1710_v27 }
 0x112   :  { %1478 = vmatpush3.bf16.msra.mxu0 %v1669_v21  ;;  %1509 = vmatpush3.bf16.msra.mxu1 %v1679_v32 }
 0x113   :  { %1479 = vmatprep.subr.bf16.mxu0 %v1670_v22  ;;  %1510 = vmatprep.subr.bf16.mxu1 %v1710_v27 }
 0x116   :  { %1480 = vmatpush3.bf16.msra.mxu0 %v1671_v23  ;;  %1511 = vmatpush3.bf16.msra.mxu1 %v1680_v33 }
 0x117   :  { %1481 = vmatprep.subr.bf16.mxu0 %v1672_v24  ;;  %1512 = vmatprep.subr.bf16.mxu1 %v1710_v27 }
 0x11a   :  { %1482 = vmatpush3.bf16.msra.mxu0 %v1673_v25  ;;  %1513 = vmatpush3.bf16.msra.mxu1 %v1681_v34 }
 0x19d   :  { %v874_v38 = vpop.f32.mrf.mxu0  ;;  %v915_v39 = vpop.f32.mrf.mxu1 }
 0x19e   :  { %v875_v40 = vadd.f32 %v874_v38, %v316_v36 }
 0x19f   :  { %v876_v41 = vpop.f32.mrf.mxu0  ;;  %v917_v42 = vpop.f32.mrf.mxu1 }
 0x1a0   :  { %v916_v43 = vadd.f32 %v915_v39, %v875_v40  ;;  %v877_v44 = vadd.f32 %v876_v41, %v320_v37 }
 0x1a1   :  { %v878_v45 = vpop.f32.mrf.mxu0  ;;  %v919_v46 = vpop.f32.mrf.mxu1 }
 0x1a2   :  { %v918_v47 = vadd.f32 %v917_v42, %v877_v44  ;;  %v1002_v48 = vmax.f32 %v916_v43, 0.0 }
 0x1a3   :  { %v879_v49 = vpop.f32.mrf.mxu0  ;;  %v920_v50 = vpop.f32.mrf.mxu1 }
 0x1a4   :  { %v1003_v51 = vmax.f32 %v918_v47, 0.0  ;;  %v1005_v53 = vpack.c.bf16 %v1002_v48, %v1002_v48 }
 0x1a6   :  { %v1006_v52 = vpack.c.bf16 %v1003_v51, %v1003_v51 }
 0x1a8   :  { %1239 = vmatprep.mubr.bf16.mxu0 %v1006_v52 }
 0x1a9   :  { %1240 = vmatmul.mubr.bf16.vlgmr.msra.gmra.mxu0 %v1005_v53 }
 0x1bd   :  { %v1439_v11 = vpop.f32.mrf.mxu0  ;;  %v1461_v14 = vpop.f32.mrf.mxu1 }
 0x1bf   :  { %v1440_v55 = vpop.f32.mrf.mxu0  ;;  %v1462_v56 = vpop.f32.mrf.mxu1 }
 0x1c0   :  { %v1441_v57 = vadd.f32 %v1440_v55, %v1439_v11  ;;  %v1463_v61 = vadd.f32 %v1462_v56, %v1461_v14 }
 0x1c1   :  { %v1442_v58 = vpop.f32.mrf.mxu0  ;;  %v1464_v59 = vpop.f32.mrf.mxu1 }
 0x1c2   :  { %v957_v60 = vadd.f32 %v1441_v57, %v324_v54 }
 0x1c3   :  { %v1443_v62 = vpop.f32.mrf.mxu0  ;;  %v1465_v63 = vpop.f32.mrf.mxu1 }
 0x1c4   :  { %v997_v0 = vadd.f32 %v1463_v61, %v957_v60 }
 0x1c6   :  { %v1004_v1 = vmax.f32 %v997_v0, 0.0 }
 0x1c8   :  { %v1007_v2 = vpack.c.bf16 %v1004_v1, %v1004_v1 }
 0x1ca   :  { %1515 = vmatmul.mubr.bf16.vlgmr.msra.gmra.mxu1 %v1007_v2 }
 0x269   :  { %v1483_v3 = vpop.f32.mrf.mxu0 }
 0x26b   :  { %v1484_v4 = vpop.f32.mrf.mxu0 }
 0x26c   :  { %v1485_v7 = vadd.f32 %v1484_v4, %v1483_v3 }
 0x26d   :  { %v1486_v5 = vpop.f32.mrf.mxu0 }
 0x26e   :  { %v1242_v12 = vadd.f32 %v1485_v7, %v1398_v10 }
 0x26f   :  { %v1487_v6 = vpop.f32.mrf.mxu0 }
 0x28a   :  { %v1281_v8 = vpop.f32.mrf.mxu1 }
 0x28b   :  { %v1282_v9 = vadd.f32 %v1281_v8, %v1242_v12 }
 0x28c   :  { %v1516_v13 = vpop.f32.mrf.mxu1 }
 0x28d   :  { %1682 = vtanh.f32 %v1282_v9 }
 0x28e   :  { %v1284_v15 = vpop.f32.mrf.mxu1 }
 0x290   :  { %v1517_v16 = vpop.f32.mrf.mxu1 }
 0x29a   :  { %v1683_v17 = vpop.eup %1682 }
 0x29b   :  { %v1288_v18 = vmul.f32 2.0, %v1683_v17 }
 0x29d   :  { %1290 = vst.msk [vmem:[%s1887_s7] sm:$0xff] %vm1289_vm2, %v1288_v18 }
 0x29e   :  { %1295 = vsyncpa [#allocation3], 1 }

</bundles_post_ra>
